<compile_context>
chip_gen: v6e
topology: v6e:2x2x1
jax: 0.10.0
libtpu: 0.0.40
codegen_flags: <defaults>
</compile_context>

<pallas_src>
import jax
import jax.numpy as jnp
from jax.experimental import pallas as pl
from jax.experimental.pallas import tpu as pltpu


def _mlp_logsoftmax_kernel(
    x_ref,
    w1_ref, b1_ref,
    w2_ref, b2_ref,
    w3_ref, b3_ref,
    w4_ref, b4_ref,
    w5_ref, b5_ref,
    out_ref,
):
    x = x_ref[...]                       # (TILE_B, insize) f32
    w1 = w1_ref[...]                     # (insize, 64)     f32

    # fc1: K = insize (2) is far too small to feed the MXU usefully -> do it as
    # `insize` broadcast FMAs on the VPU (different VLIW slot, MXU stays free).
    acc = None
    for k in range(x.shape[1]):          # static trip count (insize)
        term = x[:, k:k + 1] * w1[k:k + 1, :]
        acc = term if acc is None else acc + term
    h = jnp.maximum(acc + b1_ref[...], 0.0)

    # fc2..fc4: bf16 operands into the MXU, f32 accumulation, f32 bias + ReLU.
    h = jnp.dot(h.astype(jnp.bfloat16), w2_ref[...],
                preferred_element_type=jnp.float32) + b2_ref[...]
    h = jnp.maximum(h, 0.0)
    h = jnp.dot(h.astype(jnp.bfloat16), w3_ref[...],
                preferred_element_type=jnp.float32) + b3_ref[...]
    h = jnp.maximum(h, 0.0)
    h = jnp.dot(h.astype(jnp.bfloat16), w4_ref[...],
                preferred_element_type=jnp.float32) + b4_ref[...]
    h = jnp.maximum(h, 0.0)

    # fc5 (logits), bf16 operands / f32 accumulation.
    logits = jnp.dot(h.astype(jnp.bfloat16), w5_ref[...],
                     preferred_element_type=jnp.float32) + b5_ref[...]

    # LogSoftmax over dim=1 (feature axis), numerically stable, all in f32.
    # TODO(synk): optional lane-padding of the 8-wide fc5/log-softmax tail to
    # 128 lanes (with -inf padded biases) would avoid masked 8-lane stores; it
    # is a minor win here since fc3/fc4 dominate FLOPs.
    m = jnp.max(logits, axis=-1, keepdims=True)
    shifted = logits - m
    lse = jnp.log(jnp.sum(jnp.exp(shifted), axis=-1, keepdims=True))
    out_ref[...] = (shifted - lse).astype(out_ref.dtype)


def _round_up(n, m):
    return ((n + m - 1) // m) * m


def deeper_model_forward(x, params, tile_b=1024):
    """x: [batch, insize] float32. params: list of (W, b), W:(in,out) f32, b:(1,out) f32."""
    (w1, b1), (w2, b2), (w3, b3), (w4, b4), (w5, b5) = params
    batch, insize = x.shape
    outsize = w5.shape[1]

    # Batch tile: a multiple of 8 sublanes (ideally >=512 on real workloads),
    # never larger than the padded batch itself.
    tb = _round_up(min(tile_b, _round_up(batch, 8)), 8)
    padded = _round_up(batch, tb)
    if padded != batch:
        x = jnp.pad(x, ((0, padded - batch), (0, 0)))
    grid = (padded // tb,)

    # bf16 operands / f32 accumulation for the MXU layers; fc1 stays f32 (VPU path).
    w2b, w3b, w4b, w5b = (w.astype(jnp.bfloat16) for w in (w2, w3, w4, w5))

    h1, h2, h3, h4 = w1.shape[1], w2.shape[1], w3.shape[1], w4.shape[1]
    flops = 2 * padded * (insize * h1 + h1 * h2 + h2 * h3 + h3 * h4 + h4 * outsize)
    weight_bytes = sum(int(a.size) * a.dtype.itemsize
                       for a in (w1, b1, w2b, b2, w3b, b3, w4b, b4, w5b, b5))
    cost = pl.CostEstimate(
        flops=flops,
        transcendentals=padded * (outsize + 1),          # exp per logit + log per row
        bytes_accessed=int(x.size) * x.dtype.itemsize
                       + padded * outsize * 4 + weight_bytes,
    )

    def resident(a):
        # Full-array block, same block index every grid step -> stays resident in VMEM.
        return pl.BlockSpec(a.shape, lambda i: (0, 0))

    out = pl.pallas_call(
        _mlp_logsoftmax_kernel,
        out_shape=jax.ShapeDtypeStruct((padded, outsize), jnp.float32),
        grid=grid,
        in_specs=[pl.BlockSpec((tb, insize), lambda i: (i, 0)),
                  resident(w1), resident(b1),
                  resident(w2b), resident(b2),
                  resident(w3b), resident(b3),
                  resident(w4b), resident(b4),
                  resident(w5b), resident(b5)],
        out_specs=pl.BlockSpec((tb, outsize), lambda i: (i, 0)),
        compiler_params=pltpu.CompilerParams(
            dimension_semantics=("parallel",)),          # shard batch tiles across TCs (v7x)
        cost_estimate=cost,
    )(x, w1, b1, w2b, b2, w3b, b3, w4b, b4, w5b, b5)

    return out[:batch]


def init_params(key, insize=2, outsize=8):
    """Deterministic synthetic init (uniform, PyTorch-Linear-like scaling)."""
    dims = [insize, 64, 128, 256, 128, outsize]
    params = []
    for i in range(len(dims) - 1):
        fan_in, fan_out = dims[i], dims[i + 1]
        key, kw, kb = jax.random.split(key, 3)
        bound = 1.0 / jnp.sqrt(jnp.float32(fan_in))
        w = jax.random.uniform(kw, (fan_in, fan_out), jnp.float32, -bound, bound)
        b = jax.random.uniform(kb, (1, fan_out), jnp.float32, -bound, bound)
        params.append((w, b))
    return params


if __name__ == "__main__":
    insize, outsize = 2, 8
    batch = 20        # deliberately not a multiple of the tile -> exercises padding
    tile_b = 8        # small demo tile (grid of 3); production would use >=512

    key = jax.random.PRNGKey(0)
    key, kx = jax.random.split(key)
    x = jax.random.normal(kx, (batch, insize), jnp.float32)
    params = init_params(key, insize=insize, outsize=outsize)

    out = deeper_model_forward(x, params, tile_b=tile_b)
    out = jax.block_until_ready(out)

    assert out.shape == (batch, outsize)

    # Sanity 1: log-softmax rows exponentiate-and-sum to 1.
    row_sums = jnp.sum(jnp.exp(out), axis=1)
    assert bool(jnp.all(jnp.abs(row_sums - 1.0) < 1e-4))

    # Sanity 2: matches an f32 pure-JAX reference (kernel uses bf16 weights for
    # the MXU layers, so use a loose tolerance).
    def ref_forward(xr, ps):
        h = xr
        for i, (w, b) in enumerate(ps):
            h = h @ w + b
            if i < len(ps) - 1:
                h = jnp.maximum(h, 0.0)
        return jax.nn.log_softmax(h, axis=1)

    ref = ref_forward(x, params)
    assert bool(jnp.max(jnp.abs(out - ref)) < 5e-2)

    print("KERNEL_OK")
</pallas_src>

<mosaic_0001>
module attributes {stable_mosaic.version = 11 : i64} {
  func.func @_mlp_logsoftmax_kernel(%arg0: i32, %arg1: memref<8x2xf32, #tpu.memory_space<vmem>>, %arg2: memref<2x64xf32, #tpu.memory_space<vmem>>, %arg3: memref<1x64xf32, #tpu.memory_space<vmem>>, %arg4: memref<64x128xbf16, #tpu.memory_space<vmem>>, %arg5: memref<1x128xf32, #tpu.memory_space<vmem>>, %arg6: memref<128x256xbf16, #tpu.memory_space<vmem>>, %arg7: memref<1x256xf32, #tpu.memory_space<vmem>>, %arg8: memref<256x128xbf16, #tpu.memory_space<vmem>>, %arg9: memref<1x128xf32, #tpu.memory_space<vmem>>, %arg10: memref<128x8xbf16, #tpu.memory_space<vmem>>, %arg11: memref<1x8xf32, #tpu.memory_space<vmem>>, %arg12: memref<8x8xf32, #tpu.memory_space<vmem>>) attributes {dimension_semantics = [#tpu.dimension_semantics<parallel>], iteration_bounds = array<i64: 3>, scalar_prefetch = 0 : i64, scratch_operands = 0 : i64, tpu.core_type = #tpu.core_type<tc>, window_params = [{transform_indices = @transform_0, window_bounds = array<i64: 8, 2>}, {pipeline_mode = #tpu.pipeline_mode<synchronous>, transform_indices = @transform_1, window_bounds = array<i64: 2, 64>}, {pipeline_mode = #tpu.pipeline_mode<synchronous>, transform_indices = @transform_2, window_bounds = array<i64: 1, 64>}, {pipeline_mode = #tpu.pipeline_mode<synchronous>, transform_indices = @transform_3, window_bounds = array<i64: 64, 128>}, {pipeline_mode = #tpu.pipeline_mode<synchronous>, transform_indices = @transform_4, window_bounds = array<i64: 1, 128>}, {pipeline_mode = #tpu.pipeline_mode<synchronous>, transform_indices = @transform_5, window_bounds = array<i64: 128, 256>}, {pipeline_mode = #tpu.pipeline_mode<synchronous>, transform_indices = @transform_6, window_bounds = array<i64: 1, 256>}, {pipeline_mode = #tpu.pipeline_mode<synchronous>, transform_indices = @transform_7, window_bounds = array<i64: 256, 128>}, {pipeline_mode = #tpu.pipeline_mode<synchronous>, transform_indices = @transform_8, window_bounds = array<i64: 1, 128>}, {pipeline_mode = #tpu.pipeline_mode<synchronous>, transform_indices = @transform_9, window_bounds = array<i64: 128, 8>}, {pipeline_mode = #tpu.pipeline_mode<synchronous>, transform_indices = @transform_10, window_bounds = array<i64: 1, 8>}, {transform_indices = @transform_11, window_bounds = array<i64: 8, 8>}]} {
    %c0 = arith.constant 0 : index
    %c0_0 = arith.constant 0 : index
    %0 = vector.load %arg1[%c0, %c0_0] : memref<8x2xf32, #tpu.memory_space<vmem>>, vector<8x2xf32>
    %c0_1 = arith.constant 0 : index
    %c0_2 = arith.constant 0 : index
    %1 = vector.load %arg2[%c0_1, %c0_2] : memref<2x64xf32, #tpu.memory_space<vmem>>, vector<2x64xf32>
    %2 = vector.extract_strided_slice %0 {offsets = [0, 0], sizes = [8, 1], strides = [1, 1]} : vector<8x2xf32> to vector<8x1xf32>
    %3 = vector.extract_strided_slice %1 {offsets = [0, 0], sizes = [1, 64], strides = [1, 1]} : vector<2x64xf32> to vector<1x64xf32>
    %4 = vector.broadcast %2 : vector<8x1xf32> to vector<8x64xf32>
    %5 = vector.broadcast %3 : vector<1x64xf32> to vector<8x64xf32>
    %6 = arith.mulf %4, %5 : vector<8x64xf32>
    %7 = vector.extract_strided_slice %0 {offsets = [0, 1], sizes = [8, 1], strides = [1, 1]} : vector<8x2xf32> to vector<8x1xf32>
    %8 = vector.extract_strided_slice %1 {offsets = [1, 0], sizes = [1, 64], strides = [1, 1]} : vector<2x64xf32> to vector<1x64xf32>
    %9 = vector.broadcast %7 : vector<8x1xf32> to vector<8x64xf32>
    %10 = vector.broadcast %8 : vector<1x64xf32> to vector<8x64xf32>
    %11 = arith.mulf %9, %10 : vector<8x64xf32>
    %12 = arith.addf %6, %11 : vector<8x64xf32>
    %c0_3 = arith.constant 0 : index
    %c0_4 = arith.constant 0 : index
    %13 = vector.load %arg3[%c0_3, %c0_4] : memref<1x64xf32, #tpu.memory_space<vmem>>, vector<1x64xf32>
    %14 = vector.broadcast %13 : vector<1x64xf32> to vector<8x64xf32>
    %15 = arith.addf %12, %14 : vector<8x64xf32>
    %cst = arith.constant 0.000000e+00 : f32
    %16 = vector.broadcast %cst : f32 to vector<8x64xf32>
    %17 = arith.maximumf %15, %16 : vector<8x64xf32>
    %18 = arith.truncf %17 : vector<8x64xf32> to vector<8x64xbf16>
    %c0_5 = arith.constant 0 : index
    %c0_6 = arith.constant 0 : index
    %19 = vector.load %arg4[%c0_5, %c0_6] : memref<64x128xbf16, #tpu.memory_space<vmem>>, vector<64x128xbf16>
    %cst_7 = arith.constant dense<0.000000e+00> : vector<8x128xf32>
    %20 = tpu.matmul %18, %19, %cst_7 {dimension_numbers = #tpu.dot_dimension_numbers<[1], [0], [0], [1], [0, 0, 1, 1], [], []>} : vector<8x64xbf16>, vector<64x128xbf16>, vector<8x128xf32> -> vector<8x128xf32>
    %c0_8 = arith.constant 0 : index
    %c0_9 = arith.constant 0 : index
    %21 = vector.load %arg5[%c0_8, %c0_9] : memref<1x128xf32, #tpu.memory_space<vmem>>, vector<1x128xf32>
    %22 = vector.broadcast %21 : vector<1x128xf32> to vector<8x128xf32>
    %23 = arith.addf %20, %22 : vector<8x128xf32>
    %cst_10 = arith.constant 0.000000e+00 : f32
    %24 = vector.broadcast %cst_10 : f32 to vector<8x128xf32>
    %25 = arith.maximumf %23, %24 : vector<8x128xf32>
    %26 = arith.truncf %25 : vector<8x128xf32> to vector<8x128xbf16>
    %c0_11 = arith.constant 0 : index
    %c0_12 = arith.constant 0 : index
    %27 = vector.load %arg6[%c0_11, %c0_12] : memref<128x256xbf16, #tpu.memory_space<vmem>>, vector<128x256xbf16>
    %cst_13 = arith.constant dense<0.000000e+00> : vector<8x256xf32>
    %28 = tpu.matmul %26, %27, %cst_13 {dimension_numbers = #tpu.dot_dimension_numbers<[1], [0], [0], [1], [0, 0, 1, 1], [], []>} : vector<8x128xbf16>, vector<128x256xbf16>, vector<8x256xf32> -> vector<8x256xf32>
    %c0_14 = arith.constant 0 : index
    %c0_15 = arith.constant 0 : index
    %29 = vector.load %arg7[%c0_14, %c0_15] : memref<1x256xf32, #tpu.memory_space<vmem>>, vector<1x256xf32>
    %30 = vector.broadcast %29 : vector<1x256xf32> to vector<8x256xf32>
    %31 = arith.addf %28, %30 : vector<8x256xf32>
    %cst_16 = arith.constant 0.000000e+00 : f32
    %32 = vector.broadcast %cst_16 : f32 to vector<8x256xf32>
    %33 = arith.maximumf %31, %32 : vector<8x256xf32>
    %34 = arith.truncf %33 : vector<8x256xf32> to vector<8x256xbf16>
    %c0_17 = arith.constant 0 : index
    %c0_18 = arith.constant 0 : index
    %35 = vector.load %arg8[%c0_17, %c0_18] : memref<256x128xbf16, #tpu.memory_space<vmem>>, vector<256x128xbf16>
    %cst_19 = arith.constant dense<0.000000e+00> : vector<8x128xf32>
    %36 = tpu.matmul %34, %35, %cst_19 {dimension_numbers = #tpu.dot_dimension_numbers<[1], [0], [0], [1], [0, 0, 1, 1], [], []>} : vector<8x256xbf16>, vector<256x128xbf16>, vector<8x128xf32> -> vector<8x128xf32>
    %c0_20 = arith.constant 0 : index
    %c0_21 = arith.constant 0 : index
    %37 = vector.load %arg9[%c0_20, %c0_21] : memref<1x128xf32, #tpu.memory_space<vmem>>, vector<1x128xf32>
    %38 = vector.broadcast %37 : vector<1x128xf32> to vector<8x128xf32>
    %39 = arith.addf %36, %38 : vector<8x128xf32>
    %cst_22 = arith.constant 0.000000e+00 : f32
    %40 = vector.broadcast %cst_22 : f32 to vector<8x128xf32>
    %41 = arith.maximumf %39, %40 : vector<8x128xf32>
    %42 = arith.truncf %41 : vector<8x128xf32> to vector<8x128xbf16>
    %c0_23 = arith.constant 0 : index
    %c0_24 = arith.constant 0 : index
    %43 = vector.load %arg10[%c0_23, %c0_24] : memref<128x8xbf16, #tpu.memory_space<vmem>>, vector<128x8xbf16>
    %cst_25 = arith.constant dense<0.000000e+00> : vector<8x8xf32>
    %44 = tpu.matmul %42, %43, %cst_25 {dimension_numbers = #tpu.dot_dimension_numbers<[1], [0], [0], [1], [0, 0, 1, 1], [], []>} : vector<8x128xbf16>, vector<128x8xbf16>, vector<8x8xf32> -> vector<8x8xf32>
    %c0_26 = arith.constant 0 : index
    %c0_27 = arith.constant 0 : index
    %45 = vector.load %arg11[%c0_26, %c0_27] : memref<1x8xf32, #tpu.memory_space<vmem>>, vector<1x8xf32>
    %46 = vector.broadcast %45 : vector<1x8xf32> to vector<8x8xf32>
    %47 = arith.addf %44, %46 : vector<8x8xf32>
    %cst_28 = arith.constant dense<0xFF800000> : vector<8xf32>
    %48 = vector.multi_reduction <maximumf>, %47, %cst_28 [1] : vector<8x8xf32> to vector<8xf32>
    %49 = vector.shape_cast %48 : vector<8xf32> to vector<8x1xf32>
    %50 = vector.broadcast %49 : vector<8x1xf32> to vector<8x8xf32>
    %51 = arith.subf %47, %50 : vector<8x8xf32>
    %52 = math.exp %51 : vector<8x8xf32>
    %cst_29 = arith.constant dense<0.000000e+00> : vector<8xf32>
    %53 = vector.multi_reduction <add>, %52, %cst_29 [1] : vector<8x8xf32> to vector<8xf32>
    %54 = vector.shape_cast %53 : vector<8xf32> to vector<8x1xf32>
    %55 = math.log %54 : vector<8x1xf32>
    %56 = vector.broadcast %55 : vector<8x1xf32> to vector<8x8xf32>
    %57 = arith.subf %51, %56 : vector<8x8xf32>
    %c0_30 = arith.constant 0 : index
    %c0_31 = arith.constant 0 : index
    %58 = vector.load %arg12[%c0_30, %c0_31] : memref<8x8xf32, #tpu.memory_space<vmem>>, vector<8x8xf32>
    tpu.vector_store %arg12[%c0_30, %c0_31], %57 {strides = array<i32>} : memref<8x8xf32, #tpu.memory_space<vmem>>, vector<8x8xf32>,
    return
  }
  func.func @transform_0(%arg0: i32) -> (i32, i32) {
    %c0_i32 = arith.constant 0 : i32
    %c0_i32_0 = arith.constant 0 : i32
    return %arg0, %c0_i32 : i32, i32
  }
  func.func @transform_1(%arg0: i32) -> (i32, i32) {
    %c0_i32 = arith.constant 0 : i32
    %c0_i32_0 = arith.constant 0 : i32
    %c0_i32_1 = arith.constant 0 : i32
    return %c0_i32, %c0_i32_0 : i32, i32
  }
  func.func @transform_2(%arg0: i32) -> (i32, i32) {
    %c0_i32 = arith.constant 0 : i32
    %c0_i32_0 = arith.constant 0 : i32
    %c0_i32_1 = arith.constant 0 : i32
    return %c0_i32, %c0_i32_0 : i32, i32
  }
  func.func @transform_3(%arg0: i32) -> (i32, i32) {
    %c0_i32 = arith.constant 0 : i32
    %c0_i32_0 = arith.constant 0 : i32
    %c0_i32_1 = arith.constant 0 : i32
    return %c0_i32, %c0_i32_0 : i32, i32
  }
  func.func @transform_4(%arg0: i32) -> (i32, i32) {
    %c0_i32 = arith.constant 0 : i32
    %c0_i32_0 = arith.constant 0 : i32
    %c0_i32_1 = arith.constant 0 : i32
    return %c0_i32, %c0_i32_0 : i32, i32
  }
  func.func @transform_5(%arg0: i32) -> (i32, i32) {
    %c0_i32 = arith.constant 0 : i32
    %c0_i32_0 = arith.constant 0 : i32
    %c0_i32_1 = arith.constant 0 : i32
    return %c0_i32, %c0_i32_0 : i32, i32
  }
  func.func @transform_6(%arg0: i32) -> (i32, i32) {
    %c0_i32 = arith.constant 0 : i32
    %c0_i32_0 = arith.constant 0 : i32
    %c0_i32_1 = arith.constant 0 : i32
    return %c0_i32, %c0_i32_0 : i32, i32
  }
  func.func @transform_7(%arg0: i32) -> (i32, i32) {
    %c0_i32 = arith.constant 0 : i32
    %c0_i32_0 = arith.constant 0 : i32
    %c0_i32_1 = arith.constant 0 : i32
    return %c0_i32, %c0_i32_0 : i32, i32
  }
  func.func @transform_8(%arg0: i32) -> (i32, i32) {
    %c0_i32 = arith.constant 0 : i32
    %c0_i32_0 = arith.constant 0 : i32
    %c0_i32_1 = arith.constant 0 : i32
    return %c0_i32, %c0_i32_0 : i32, i32
  }
  func.func @transform_9(%arg0: i32) -> (i32, i32) {
    %c0_i32 = arith.constant 0 : i32
    %c0_i32_0 = arith.constant 0 : i32
    %c0_i32_1 = arith.constant 0 : i32
    return %c0_i32, %c0_i32_0 : i32, i32
  }
  func.func @transform_10(%arg0: i32) -> (i32, i32) {
    %c0_i32 = arith.constant 0 : i32
    %c0_i32_0 = arith.constant 0 : i32
    %c0_i32_1 = arith.constant 0 : i32
    return %c0_i32, %c0_i32_0 : i32, i32
  }
  func.func @transform_11(%arg0: i32) -> (i32, i32) {
    %c0_i32 = arith.constant 0 : i32
    %c0_i32_0 = arith.constant 0 : i32
    return %arg0, %c0_i32 : i32, i32
  }
}

</mosaic_0001>

<bundles_post_ra>
// kernel: tpu_custom_call.1
= control target key start
LH: loop header
LB: loop body
LE: loop exit
PB: predicated region body
PF: predicated region fallthrough
CT: control target
= control target key end

     0   :  { %16 = vsyncpa [#allocation3], 0  ;;  %s1577_s0 = inlined_call_operand.vmem [shape: f32[24,2], index: 0, kind: input, shape index: {}]   ;;  %s1578_s1 = inlined_call_operand.vmem [shape: f32[2,64], index: 1, kind: input, shape index: {}]   ;;  %s1579_s2 = inlined_call_operand.vmem [shape: f32[1,64], index: 2, kind: input, shape index: {}]   ;;  %s1580_s3 = inlined_call_operand.vmem [shape: bf16[64,128], index: 3, kind: input, shape index: {}]   ;;  %s1581_s4 = inlined_call_operand.vmem [shape: f32[1,128], index: 4, kind: input, shape index: {}]   ;;  %s1582_s5 = inlined_call_operand.hbm [shape: bf16[128,256], index: 5, kind: input, shape index: {}]   ;;  %s1583_s6 = inlined_call_operand.vmem [shape: f32[1,256], index: 6, kind: input, shape index: {}]   ;;  %s1584_s7 = inlined_call_operand.hbm [shape: bf16[256,128], index: 7, kind: input, shape index: {}]   ;;  %s1585_s8 = inlined_call_operand.vmem [shape: f32[1,128], index: 8, kind: input, shape index: {}]   ;;  %s1586_s9 = inlined_call_operand.vmem [shape: bf16[128,8], index: 9, kind: input, shape index: {}]   ;;  %s1587_s10 = inlined_call_operand.vmem [shape: f32[1,8], index: 10, kind: input, shape index: {}]   ;;  %s1588_s11 = inlined_call_operand.vmem [shape: f32[24,8], index: 11, kind: output, shape index: {}]  }
   0x1   :  { %17 = vsyncpa [#allocation5], 0  ;;  %s1423_s17 = smov 0  }
   0x2 LB: > { %s1353_s18 = smov [#allocation2]   ;;  %s1429_s20 = sadd.s32 4294967295, %s1351_s17   ;;  %s1351_s17 = sphi %s1423_s17, %s23_s17  }
   0x3   : > { %s314_s19 = sshll.u32 %s1353_s18, 4  ;;  %p1062_p0 = scmp.ge.s32.totalorder %s1351_s17, 1  ;;  %s315_s19 = int_to_ptr.vmem [resolvable:$true] %s314_s19 }
   0x4   : > { %p290_p1 = scmp.lt.s32.totalorder %s1351_s17, 4  ;;  %p1205_p3 = scmp.eq.s32.totalorder %s1429_s20, 0 }
   0x5   : > { %s1354_s22 = smov [#allocation4]   ;;  %s1296_s25 = scalar_lea.vmem %s315_s19, 2048 }
   0x6   : > { %p1433_p2 = pnand %p1062_p0, %p290_p1  ;;  %s330_s23 = sshll.u32 %s1354_s22, 4  ;;  %s331_s23 = int_to_ptr.vmem [resolvable:$true] %s330_s23 }
   0x7   : > { %p1297_p7 = scmp.ne.s32.totalorder %s315_s19, %s1296_s25  ;;  %p1304_p10 = scmp.lt.s32.totalorder %s315_s19, %s315_s19 }
   0x8   : > { %p1198_p4 = pneg %p1433_p2  ;;  %p1305_p11 = scmp.lt.s32.totalorder %s1296_s25, %s1296_s25 }
   0xa   : > { %p1442_p5 = pnand %p1205_p3, %p1198_p4  ;;  %p1306_p12 = por %p1305_p11, %p1304_p10 }
   0xc   : > { %p1287_p6 = pneg %p1442_p5 }
   0xe   : > { %p1299_p8 = pnand %p1297_p7, %p1287_p6 }
  0x10   : > { %p1300_p9 = pneg %p1299_p8 }
  0x12   : > { %p1307_p13 = pnand %p1306_p12, %p1300_p9 }
  0x14   : > { %1310 = shalt.err (!%p1307_p13)
}
  0x15   : > { %s1355_s26 = smov 128   ;;  %s1356_s27 = smov 8  }
  0x16   : > { %1201 = dma.hbm_to_vmem [thread:$0]  (!%p1442_p5), %s1582_s5, 2048, %s315_s19, [#allocation3], %s1355_s26, %s1355_s26, %s1356_s27  }
  0x17   : > { %s1322_s30 = scalar_lea.vmem %s331_s23, 2048  ;;  %p1330_p7 = scmp.lt.s32.totalorder %s331_s23, %s331_s23 }
  0x18   : > { %p1323_p0 = scmp.ne.s32.totalorder %s331_s23, %s1322_s30  ;;  %p1331_p8 = scmp.lt.s32.totalorder %s1322_s30, %s1322_s30 }
  0x1a   : > { %p1325_p1 = pnand %p1323_p0, %p1287_p6  ;;  %p1332_p10 = por %p1331_p8, %p1330_p7 }
  0x1c   : > { %p1326_p4 = pneg %p1325_p1 }
  0x1e   : > { %p1333_p9 = pnand %p1332_p10, %p1326_p4 }
  0x20   : > { %1336 = shalt.err (!%p1333_p9)
}
  0x21   : > { %s1357_s12 = smov 64   ;;  %s1358_s13 = smov 4  }
  0x22   : > { %1204 = dma.hbm_to_vmem [thread:$0]  (!%p1442_p5), %s1584_s7, 2048, %s331_s23, [#allocation5], %s1357_s12, %s1357_s12, %s1358_s13  }
  0x23   : > { %362 = sbr.rel (%p1433_p2) target bundleno = 1302 (0x516), region = 64 }
  0x28   : > { %1342 = dma.done.wait (%p1205_p3), [#allocation3], 2048  }
  0x29   : > { %1344 = vsyncadd (%p1205_p3), [#allocation3], 4294965248 }
  0x2a   : > { %1346 = dma.done.wait (%p1205_p3), [#allocation5], 2048  }
  0x2b   : > { %1348 = vsyncadd (%p1205_p3), [#allocation5], 4294965248  ;;  %p404_p6 = scmp.lt.s32.totalorder %s1429_s20, 2  ;;  %v1359_v0 = vmov 0   ;;  %v1360_v1 = vmov 0.0   ;;  %v1229_v3 = vld [vmem:[%s1580_s3 + $0x18] sm:$0xff]   ;;  %v420_v21 = vlaneseq }
  0x2c   : > { %1227 = vset.pattern.permute.xlu0 %v1359_v0  ;;  %1158 = vmatprep.subr.bf16.mxu0 %v1360_v1  ;;  %v1230_v4 = vld [vmem:[%s1580_s3 + $0x10] sm:$0xff]   ;;  %v1361_v5 = vmov 1   ;;  %v1231_v6 = vld [vmem:[%s1580_s3 + $0x8] sm:$0xff]   ;;  %v1232_v7 = vld [vmem:[%s1580_s3] sm:$0xff]   ;;  %vm1362_vm0 = vmmov 0   ;;  %vm484_vm1 = vcmask 523264  }
  0x2d   : > { %s1592_s20 = smov (!%p404_p6, %s1429_s20), 2  ;;  %670 = vmatprep.mubr.bf16.mxu1 %v1359_v0  ;;  %1159 = vmatpush3.bf16.msra.mxu0 %v1229_v3  ;;  %v1233_v8 = vld [vmem:[#allocation2 + $0x74] ss:$8 sps:$4 sm:$0xff]   ;;  %v1235_v9 = vld [vmem:[#allocation2 + $0x70] ss:$8 sps:$4 sm:$0xff]   ;;  %v1502_v22 = vshrl.u32 %v420_v21, 7 }
  0x2e   : > { %s1069_s16 = sshll.u32 %s1592_s20, 3  ;;  %1160 = vmatprep.subr.bf16.mxu0 %v1360_v1  ;;  %1166 = vmatprep.mubr.msk.bf16.mxu0 %vm1362_vm0, %v1360_v1  ;;  %v1236_v10 = vld [vmem:[#allocation2 + $0x64] ss:$8 sps:$4 sm:$0xff]   ;;  %v1238_v11 = vld [vmem:[#allocation2 + $0x60] ss:$8 sps:$4 sm:$0xff]   ;;  %v1257_v40 = vld [vmem:[#allocation4 + $0x78] sm:$0xff]  }
  0x2f   : > { %s407_s21 = scalar_lea.vmem %s1577_s0, %s1069_s16  ;;  %638 = vmatprep.subr.bf16.mxu1 %v1233_v8  ;;  %v1239_v12 = vld [vmem:[#allocation2 + $0x54] ss:$8 sps:$4 sm:$0xff]   ;;  %v1241_v13 = vld [vmem:[#allocation2 + $0x50] ss:$8 sps:$4 sm:$0xff]   ;;  %v1242_v14 = vld [vmem:[#allocation2 + $0x44] ss:$8 sps:$4 sm:$0xff]   ;;  %s411_s28 = scalar_lea.vmem %s1588_s11, %s1069_s16 }
  0x30   : > { %v413_v2 = vld [vmem:[%s407_s21] sm:$0xff]  ;;  %639 = vmatpush1.bf16.msra.mxu1 %v1235_v9  ;;  %v1245_v16 = vld [vmem:[#allocation2 + $0x34] ss:$8 sps:$4 sm:$0xff]   ;;  %v1247_v17 = vld [vmem:[#allocation2 + $0x30] ss:$8 sps:$4 sm:$0xff]   ;;  %v422_v23 = vsub.s32 0, %v1502_v22 }
  0x31   : > { %417 = vperm.xlu0 %1227, %v413_v2   ;;  %1161 = vmatpush3.bf16.msra.mxu0 %v1230_v4  ;;  %v1244_v15 = vld [vmem:[#allocation2 + $0x40] ss:$8 sps:$4 sm:$0xff]   ;;  %v1248_v18 = vld [vmem:[#allocation2 + $0x24] ss:$8 sps:$4 sm:$0xff]   ;;  %v1251_v20 = vld [vmem:[#allocation2 + $0x14] ss:$8 sps:$4 sm:$0xff]  }
  0x32   : > { %1162 = vmatprep.subr.bf16.mxu0 %v1360_v1  ;;  %640 = vmatprep.subr.bf16.mxu1 %v1236_v10  ;;  %v1250_v19 = vld [vmem:[#allocation2 + $0x20] ss:$8 sps:$4 sm:$0xff]   ;;  %v431_v24 = vsub.s32 1, %v1502_v22  ;;  %v1253_v37 = vld [vmem:[#allocation2 + $0x10] ss:$8 sps:$4 sm:$0xff]   ;;  %vm971_vm2 = vcmask 64512  }
  0x33   : > { %v414_v25 = vld [vmem:[%s1578_s1] sm:$0x3]  ;;  %v1254_v38 = vld [vmem:[#allocation2 + $0x4] ss:$8 sps:$4 sm:$0xff]   ;;  %v1258_v41 = vld [vmem:[#allocation4 + $0x38] sm:$0xff]  }
  0x34   : > { %641 = vmatpush1.bf16.msra.mxu1 %v1238_v11  ;;  %v423_v27 = vrot.slane %v414_v25, %v422_v23  ;;  %v432_v28 = vrot.slane %v414_v25, %v431_v24  ;;  %v1071_v32 = vld [vmem:[%s1579_s2] ss:$0 sm:$0xff]  ;;  %v1259_v42 = vld [vmem:[#allocation4 + $0x70] sm:$0xff]   ;;  %v1261_v44 = vld [vmem:[#allocation4 + $0x68] sm:$0xff]  }
  0x35   : > { %1228 = vset.pattern.permute.xlu0 %v1361_v5  ;;  %1163 = vmatpush3.bf16.msra.mxu0 %v1231_v6  ;;  %v1256_v39 = vld [vmem:[#allocation2] ss:$8 sps:$4 sm:$0xff]   ;;  %v1260_v43 = vld [vmem:[#allocation4 + $0x30] sm:$0xff]   ;;  %v1265_v48 = vld [vmem:[#allocation4 + $0x58] sm:$0xff]  }
  0x36   : > { %426 = vperm.xlu0 %1228, %v413_v2   ;;  %1164 = vmatprep.subr.bf16.mxu0 %v1360_v1  ;;  %v1262_v45 = vld [vmem:[#allocation4 + $0x28] sm:$0xff]   ;;  %v1263_v46 = vld [vmem:[#allocation4 + $0x60] sm:$0xff]   ;;  %v1266_v49 = vld [vmem:[#allocation4 + $0x18] sm:$0xff]  }
  0x37   : > { %642 = vmatprep.subr.bf16.mxu1 %v1239_v12  ;;  %v1264_v47 = vld [vmem:[#allocation4 + $0x20] sm:$0xff]   ;;  %v1267_v50 = vld [vmem:[#allocation4 + $0x50] sm:$0xff]   ;;  %v1269_v60 = vld [vmem:[#allocation4 + $0x48] sm:$0xff]  }
  0x38   : > { %643 = vmatpush1.bf16.msra.mxu1 %v1241_v13  ;;  %v1268_v51 = vld [vmem:[#allocation4 + $0x10] sm:$0xff]   ;;  %v1072_v52 = vld [vmem:[%s1581_s4] ss:$0 sm:$0xff]  ;;  %v1270_v61 = vld [vmem:[#allocation4 + $0x8] sm:$0xff]  }
  0x39   : > { %1165 = vmatpush3.bf16.msra.mxu0 %v1232_v7  ;;  %644 = vmatprep.subr.bf16.mxu1 %v1242_v14  ;;  %v1271_v62 = vld [vmem:[#allocation4 + $0x40] sm:$0xff]   ;;  %v1273_v0 = vld [vmem:[%s1586_s9 + $0x38] sm:$0xff]   ;;  %v1274_v2 = vld [vmem:[%s1586_s9 + $0x30] sm:$0xff]  }
  0x3a   : > { %1127 = vmatprep.subr.bf16.mxu0 %v1257_v40  ;;  %v1272_v63 = vld [vmem:[#allocation4] sm:$0xff]   ;;  %v1275_v3 = vld [vmem:[%s1586_s9 + $0x28] sm:$0xff]   ;;  %v1277_v5 = vld [vmem:[%s1586_s9 + $0x18] sm:$0xff]  }
  0x3b   : > { %v1276_v4 = vld [vmem:[%s1586_s9 + $0x20] sm:$0xff]  }
  0x3c   : > { %645 = vmatpush1.bf16.msra.mxu1 %v1244_v15  ;;  %v546_v6 = vld [vmem:[%s1583_s6] sm:$0x3] }
  0x3d   : > { %646 = vmatprep.subr.bf16.mxu1 %v1245_v16  ;;  %v551_v7 = vrot.slane %v546_v6, %v422_v23  ;;  %v555_v8 = vrot.slane %v546_v6, %v431_v24  ;;  %v1280_v21 = vld [vmem:[%s1586_s9] sm:$0xff]  }
  0x3e   : > { %v1094_v23 = vld [vmem:[%s1585_s8] ss:$0 sm:$0xff] }
  0x40   : > { %647 = vmatpush1.bf16.msra.mxu1 %v1247_v17 }
  0x41   : > { %648 = vmatprep.subr.bf16.mxu1 %v1248_v18 }
  0x44   : > { %649 = vmatpush1.bf16.msra.mxu1 %v1250_v19  ;;  %v1278_v19 = vld [vmem:[%s1586_s9 + $0x10] sm:$0xff]  }
  0x45   : > { %650 = vmatprep.subr.bf16.mxu1 %v1251_v20  ;;  %v1279_v20 = vld [vmem:[%s1586_s9 + $0x8] sm:$0xff]  }
  0x48   : > { %651 = vmatpush1.bf16.msra.mxu1 %v1253_v37 }
  0x49   : > { %652 = vmatprep.subr.bf16.mxu1 %v1254_v38 }
  0x4c   : > { %653 = vmatpush1.bf16.msra.mxu1 %v1256_v39 }
  0x4d   : > { %1170 = vmatprep.subr.bf16.mxu1 %v1360_v1 }
  0xac   : > { %v418_v26 = vpop.permute.xlu0 %417 }
  0xad   : > { %v424_v30 = vmul.f32 %v423_v27, %v418_v26 }
  0xb1   : > { %v427_v29 = vpop.permute.xlu0 %426 }
  0xb2   : > { %v433_v31 = vmul.f32 %v432_v28, %v427_v29 }
  0xb4   : > { %v434_v33 = vadd.f32 %v433_v31, %v424_v30 }
  0xb6   : > { %v442_v34 = vadd.f32 %v1071_v32, %v434_v33 }
  0xb8   : > { %v443_v35 = vmax.f32 %v442_v34, 0.0 }
  0xba   : > { %v444_v36 = vpack.c.bf16 %v443_v35, %v443_v35 }
  0xbc   : > { %1167 = vmatmul.mubr.msk.bf16.vlgmr.msra.gmra.mxu0 %vm484_vm1, %v444_v36 }
  0xbd   : > { %1128 = vmatpush3.bf16.msra.mxu0 %v1258_v41 }
  0xbe   : > { %1129 = vmatprep.subr.bf16.mxu0 %v1259_v42 }
  0xc1   : > { %1130 = vmatpush3.bf16.msra.mxu0 %v1260_v43 }
  0xc2   : > { %1131 = vmatprep.subr.bf16.mxu0 %v1261_v44 }
  0xc5   : > { %1132 = vmatpush3.bf16.msra.mxu0 %v1262_v45 }
  0xc6   : > { %1133 = vmatprep.subr.bf16.mxu0 %v1263_v46 }
  0xc9   : > { %1134 = vmatpush3.bf16.msra.mxu0 %v1264_v47 }
  0xca   : > { %1135 = vmatprep.subr.bf16.mxu0 %v1265_v48 }
  0xcd   : > { %1136 = vmatpush3.bf16.msra.mxu0 %v1266_v49 }
  0xce   : > { %1137 = vmatprep.subr.bf16.mxu0 %v1267_v50 }
  0xd1   : > { %1138 = vmatpush3.bf16.msra.mxu0 %v1268_v51 }
  0xd2   : > { %1139 = vmatprep.subr.bf16.mxu0 %v1269_v60 }
  0xd5   : > { %1140 = vmatpush3.bf16.msra.mxu0 %v1270_v61 }
  0xd6   : > { %1141 = vmatprep.subr.bf16.mxu0 %v1271_v62 }
  0xd9   : > { %1142 = vmatpush3.bf16.msra.mxu0 %v1272_v63 }
 0x17c   : > { %v522_v53 = vpop.f32.mrf.mxu0 }
 0x17d   : > { %v523_v54 = vadd.f32 %v1072_v52, %v522_v53 }
 0x17e   : > { %v1168_v55 = vpop.f32.mrf.mxu0 }
 0x17f   : > { %v528_v56 = vmax.f32 %v523_v54, 0.0 }
 0x180   : > { %v525_v57 = vpop.f32.mrf.mxu0 }
 0x181   : > { %v529_v58 = vpack.c.bf16 %v528_v56, %v528_v56 }
 0x182   : > { %v1169_v59 = vpop.f32.mrf.mxu0 }
 0x183   : > { %671 = vmatmul.mubr.bf16.vlgmr.msra.gmra.mxu1 %v529_v58 }
 0x184   : > { %1186 = vmatprep.mubr.msk.bf16.mxu1 %vm1362_vm0, %v1360_v1  ;;  %1171 = vmatpush3.bf16.msra.mxu1 %v1273_v0 }
 0x185   : > { %1172 = vmatprep.subr.bf16.mxu1 %v1360_v1 }
 0x188   : > { %1173 = vmatpush3.bf16.msra.mxu1 %v1274_v2 }
 0x189   : > { %1174 = vmatprep.subr.bf16.mxu1 %v1360_v1 }
 0x18c   : > { %1175 = vmatpush3.bf16.msra.mxu1 %v1275_v3 }
 0x18d   : > { %1176 = vmatprep.subr.bf16.mxu1 %v1360_v1 }
 0x190   : > { %1177 = vmatpush3.bf16.msra.mxu1 %v1276_v4 }
 0x191   : > { %1178 = vmatprep.subr.bf16.mxu1 %v1360_v1 }
 0x194   : > { %1179 = vmatpush3.bf16.msra.mxu1 %v1277_v5 }
 0x195   : > { %1180 = vmatprep.subr.bf16.mxu1 %v1360_v1 }
 0x198   : > { %1181 = vmatpush3.bf16.msra.mxu1 %v1278_v19 }
 0x199   : > { %1182 = vmatprep.subr.bf16.mxu1 %v1360_v1 }
 0x19c   : > { %1183 = vmatpush3.bf16.msra.mxu1 %v1279_v20 }
 0x19d   : > { %1184 = vmatprep.subr.bf16.mxu1 %v1360_v1  ;;  %v1111_v1 = vld [vmem:[%s1587_s10] ss:$0 sm:$0xff] }
 0x1a0   : > { %1185 = vmatpush3.bf16.msra.mxu1 %v1280_v21 }
 0x243   : > { %v672_v9 = vpop.f32.mrf.mxu1 }
 0x244   : > { %v673_v10 = vadd.f32 %v672_v9, %v551_v7 }
 0x245   : > { %v674_v11 = vpop.f32.mrf.mxu1 }
 0x246   : > { %v675_v12 = vadd.f32 %v674_v11, %v555_v8  ;;  %v679_v13 = vmax.f32 %v673_v10, 0.0 }
 0x247   : > { %v676_v14 = vpop.f32.mrf.mxu1 }
 0x248   : > { %v680_v15 = vmax.f32 %v675_v12, 0.0  ;;  %v681_v18 = vpack.c.bf16 %v679_v13, %v679_v13 }
 0x249   : > { %v677_v16 = vpop.f32.mrf.mxu1 }
 0x24a   : > { %v682_v17 = vpack.c.bf16 %v680_v15, %v680_v15 }
 0x24c   : > { %850 = vmatprep.mubr.bf16.mxu0 %v682_v17 }
 0x24d   : > { %851 = vmatmul.mubr.bf16.vlgmr.msra.gmra.mxu0 %v681_v18 }
 0x30d   : > { %v1143_v22 = vpop.f32.mrf.mxu0 }
 0x30f   : > { %v1144_v24 = vpop.f32.mrf.mxu0 }
 0x310   : > { %v1145_v25 = vadd.f32 %v1144_v24, %v1143_v22 }
 0x311   : > { %v1146_v26 = vpop.f32.mrf.mxu0 }
 0x312   : > { %v853_v27 = vadd.f32 %v1145_v25, %v1094_v23 }
 0x313   : > { %v1147_v28 = vpop.f32.mrf.mxu0 }
 0x314   : > { %v858_v29 = vmax.f32 %v853_v27, 0.0 }
 0x316   : > { %v859_v30 = vpack.c.bf16 %v858_v29, %v858_v29 }
 0x318   : > { %1187 = vmatmul.mubr.bf16.vlgmr.msra.gmra.mxu1 %v859_v30 }
 0x3d8   : > { %v965_v31 = vpop.f32.mrf.mxu1 }
 0x3d9   : > { %v966_v32 = vadd.f32 %v1111_v1, %v965_v31 }
 0x3da   : > { %v1188_v33 = vpop.f32.mrf.mxu1 }
 0x3db   : > { %v972_v34 = vsel %vm971_vm2, %v966_v32, -inf }
 0x3dc   : > { %973 = vmax.xlane.f32.xlu1 %v972_v34  ;;  %v968_v35 = vpop.f32.mrf.mxu1 }
 0x3de   : > { %v1189_v36 = vpop.f32.mrf.mxu1 }
 0x465   : > { %v974_v37 = vpop.xlane.xlu1 %973 }
 0x466   : > { %v975_v38 = vsub.f32 %v966_v32, %v974_v37 }
 0x468   : > { %v976_v39 = vmul.f32 1.442695, %v975_v38 }
 0x46a   : > { %1281 = vpow2.f32 %v976_v39 }
 0x477   : > { %v1282_v40 = vpop.eup %1281 }
 0x478   : > { %v978_v41 = vsel %vm971_vm2, %v1282_v40, 0.0 }
 0x479   : > { %979 = vadd.xlane.f32.xlu1 %v978_v41 }
 0x502   : > { %v980_v42 = vpop.xlane.xlu1 %979 }
 0x503   : > { %1283 = vlog2.f32 %v980_v42 }
 0x510   : > { %v1284_v43 = vpop.eup %1283 }
 0x511   : > { %v982_v44 = vmul.f32 0.6931472, %v1284_v43 }
 0x513   : > { %v983_v45 = vsub.f32 %v975_v38, %v982_v44 }
 0x515   : > { %984 = vst.msk [vmem:[%s411_s28] sm:$0xff] %vm971_vm2, %v983_v45 }
 0x516 PF: > { %s23_s17 = sadd.s32 1, %s1351_s17  }
 0x517   : > { %p20_p2 = scmp.ge.s32.totalorder %s23_s17, 5  }
 0x519   :  { %22 = sbr.rel (!%p20_p2) target bundleno = 2 (0x2), region = 103 }
 0x51e   :  { %1004 = vsyncpa [#allocation3], 1 }
 0x51f   :  { %1006 = vsyncpa [#allocation3 + $0x1], 1 }
 0x520   :  { %1007 = vsyncpa [#allocation5], 1 }

</bundles_post_ra>
